<compile_context>
chip_gen: v6e
topology: v6e:2x2x1
jax: 0.10.0
libtpu: 0.0.40
codegen_flags: <defaults>
</compile_context>

<pallas_src>
import jax
import jax.numpy as jnp
from jax.experimental import pallas as pl
from jax.experimental.pallas import tpu as pltpu


def _generator_kernel(x_ref,
                      w1_ref, b1_ref,
                      w2_ref, b2_ref,
                      w3_ref, b3_ref,
                      w4_ref, b4_ref,
                      o_ref):
    """Fused 4-layer MLP on one batch tile: (Linear+ReLU) x3 -> Linear -> Tanh.

    Matmuls run in the weights' dtype (f32 or bf16) with f32 accumulation on the
    MXU; bias adds and tanh stay in f32 (VPU/EUP epilogue).  ReLU runs in the
    compute dtype (identical numerics, cheaper on packed bf16 vregs).
    """
    cdt = w1_ref.dtype
    h = x_ref[...].astype(cdt)

    h = jnp.dot(h, w1_ref[...], preferred_element_type=jnp.float32) + b1_ref[...]
    h = jnp.maximum(h.astype(cdt), 0.0)

    h = jnp.dot(h, w2_ref[...], preferred_element_type=jnp.float32) + b2_ref[...]
    h = jnp.maximum(h.astype(cdt), 0.0)

    h = jnp.dot(h, w3_ref[...], preferred_element_type=jnp.float32) + b3_ref[...]
    h = jnp.maximum(h.astype(cdt), 0.0)

    h = jnp.dot(h, w4_ref[...], preferred_element_type=jnp.float32) + b4_ref[...]
    o_ref[...] = jnp.tanh(h)


def prepare_generator_params(params, *, compute_dtype=jnp.float32):
    """One-time preprocessing of Generator params for the Pallas kernel.

    Do this ONCE (after init / load / each optimizer step), NOT per forward call:
      * pads the final layer's output dim up to a multiple of 128 so the last
        matmul and the output store are lane-dense (padded columns produce
        tanh(0) == 0),
      * casts weights to `compute_dtype` (jnp.float32 for exact parity, or
        jnp.bfloat16 to halve the weight DMA bytes — beneficial on v5e/v6e/v7x
        alike since the MXU accumulates in f32 and the epilogue stays f32),
      * keeps biases in f32 for the elementwise epilogue.
    """
    w4, b4 = params["w4"], params["b4"]
    airfoil_dim = w4.shape[1]
    out_pad = pl.cdiv(airfoil_dim, 128) * 128
    if out_pad != airfoil_dim:
        w4 = jnp.pad(w4, ((0, 0), (0, out_pad - airfoil_dim)))
        b4 = jnp.pad(b4, ((0, 0), (0, out_pad - airfoil_dim)))

    weights = tuple(w.astype(compute_dtype)
                    for w in (params["w1"], params["w2"], params["w3"], w4))
    biases = tuple(b.astype(jnp.float32)
                   for b in (params["b1"], params["b2"], params["b3"], b4))
    return {"weights": weights, "biases": biases,
            "airfoil_dim": airfoil_dim, "out_pad": out_pad}


def _default_batch_tile(B):
    """Largest multiple-of-8 divisor of B that is <= 512 and (when B >= 16)
    leaves at least 2 grid steps, so v7x's two TensorCores both get work.
    Falls back to a single full-batch block when no such divisor exists."""
    cap = 512
    if B >= 16:
        cap = min(cap, B // 2)
    t = (cap // 8) * 8
    while t >= 8:
        if B % t == 0:
            return t
        t -= 8
    return B


def generator_forward(x, prepared, *, batch_tile=None, return_padded=False):
    """x: (B, latent_dim) f32 (or compute_dtype). prepared: prepare_generator_params().

    return_padded=True returns the lane-dense (B, out_pad) result (extra columns
    are exactly 0), avoiding the de-pad slice for consumers that can keep the
    padded layout.
    """
    weights, biases = prepared["weights"], prepared["biases"]
    airfoil_dim, out_pad = prepared["airfoil_dim"], prepared["out_pad"]
    B, latent_dim = x.shape
    hidden_dim = weights[0].shape[1]

    if batch_tile is None:
        batch_tile = _default_batch_tile(B)
    assert B % batch_tile == 0, "batch must be divisible by batch_tile"
    assert batch_tile == B or batch_tile % 8 == 0, "batch_tile must be a multiple of 8"
    grid = (B // batch_tile,)

    def resident(arr):
        # Constant index_map -> block is DMA'd once and stays resident in VMEM
        # across all grid steps.  Weights + biases total < 1 MB here, so the
        # default 2-deep buffering is harmless; if hidden dims grow, single-buffer
        # these specs (pipeline_mode=pl.Buffered(1)) to reclaim the VMEM.
        return pl.BlockSpec(arr.shape, lambda i: (0, 0))

    flops = 2 * B * (latent_dim * hidden_dim + hidden_dim * 512
                     + 512 * 256 + 256 * out_pad)
    bytes_accessed = (x.size * x.dtype.itemsize
                      + sum(a.size * a.dtype.itemsize for a in weights)
                      + sum(a.size * a.dtype.itemsize for a in biases)
                      + B * out_pad * 4)
    cost = pl.CostEstimate(flops=flops,
                           transcendentals=B * airfoil_dim,
                           bytes_accessed=bytes_accessed)

    out_padded = pl.pallas_call(
        _generator_kernel,
        out_shape=jax.ShapeDtypeStruct((B, out_pad), jnp.float32),
        grid_spec=pl.GridSpec(
            grid=grid,
            in_specs=[
                pl.BlockSpec((batch_tile, latent_dim), lambda i: (i, 0)),
                resident(weights[0]), resident(biases[0]),
                resident(weights[1]), resident(biases[1]),
                resident(weights[2]), resident(biases[2]),
                resident(weights[3]), resident(biases[3]),
            ],
            out_specs=pl.BlockSpec((batch_tile, out_pad), lambda i: (i, 0)),
        ),
        compiler_params=pltpu.CompilerParams(
            dimension_semantics=("parallel",)),
        cost_estimate=cost,
    )(x, weights[0], biases[0], weights[1], biases[1],
      weights[2], biases[2], weights[3], biases[3])

    if return_padded or out_pad == airfoil_dim:
        return out_padded
    return out_padded[:, :airfoil_dim]


def init_generator_params(key, latent_dim, hidden_dim, airfoil_dim):
    """Deterministic synthetic init (PyTorch-Linear-like uniform fan-in scaling)."""
    dims = [(latent_dim, hidden_dim), (hidden_dim, 512), (512, 256), (256, airfoil_dim)]
    params = {}
    for idx, (fan_in, fan_out) in enumerate(dims, start=1):
        key, kw, kb = jax.random.split(key, 3)
        bound = 1.0 / jnp.sqrt(jnp.float32(fan_in))
        params[f"w{idx}"] = jax.random.uniform(
            kw, (fan_in, fan_out), jnp.float32, minval=-bound, maxval=bound)
        params[f"b{idx}"] = jax.random.uniform(
            kb, (1, fan_out), jnp.float32, minval=-bound, maxval=bound)
    return params


def reference_forward(x, p):
    h = jnp.maximum(x @ p["w1"] + p["b1"], 0.0)
    h = jnp.maximum(h @ p["w2"] + p["b2"], 0.0)
    h = jnp.maximum(h @ p["w3"] + p["b3"], 0.0)
    return jnp.tanh(h @ p["w4"] + p["b4"])


# TODO(synk): optimizer (Adam), save_model/load_model are training / I/O utilities
# with no forward-pass Pallas equivalent; only forward() is implemented here.

if __name__ == "__main__":
    # Small, forward-consistent shapes: batch=16 latent noise vectors.
    latent_dim, hidden_dim, airfoil_dim = 32, 128, 96
    batch = 16

    key = jax.random.PRNGKey(0)
    key, kx = jax.random.split(key)
    x = jax.random.normal(kx, (batch, latent_dim), jnp.float32)
    params = init_generator_params(key, latent_dim, hidden_dim, airfoil_dim)

    ref = reference_forward(x, params)

    # f32 path: exact parity with the reference (all chips). prepare_* runs once.
    prep_f32 = prepare_generator_params(params, compute_dtype=jnp.float32)
    out_f32 = jax.block_until_ready(generator_forward(x, prep_f32))
    assert out_f32.shape == (batch, airfoil_dim)
    assert jnp.allclose(out_f32, ref, atol=1e-5, rtol=1e-5), "f32 mismatch vs reference"

    # bf16 weight/activation path (recommended fast path on v5e/v6e/v7x):
    # f32 MXU accumulation + f32 epilogue; intermediates round to bf16 between
    # layers, hence the looser tolerance.
    prep_bf16 = prepare_generator_params(params, compute_dtype=jnp.bfloat16)
    out_bf16 = jax.block_until_ready(generator_forward(x, prep_bf16))
    assert out_bf16.shape == (batch, airfoil_dim)
    assert jnp.allclose(out_bf16, ref, atol=5e-2, rtol=5e-2), "bf16 mismatch vs reference"

    # Padded-layout path: skips the wrapper de-pad slice; extra columns are 0.
    out_pad = jax.block_until_ready(generator_forward(x, prep_f32, return_padded=True))
    assert out_pad.shape == (batch, prep_f32["out_pad"])
    assert jnp.allclose(out_pad[:, :airfoil_dim], ref, atol=1e-5, rtol=1e-5)
    assert jnp.all(out_pad[:, airfoil_dim:] == 0.0)

    print("KERNEL_OK")
</pallas_src>

<mosaic_0001>
module attributes {stable_mosaic.version = 11 : i64} {
  func.func @_generator_kernel(%arg0: i32, %arg1: memref<8x32xf32, #tpu.memory_space<vmem>>, %arg2: memref<32x128xf32, #tpu.memory_space<vmem>>, %arg3: memref<1x128xf32, #tpu.memory_space<vmem>>, %arg4: memref<128x512xf32, #tpu.memory_space<vmem>>, %arg5: memref<1x512xf32, #tpu.memory_space<vmem>>, %arg6: memref<512x256xf32, #tpu.memory_space<vmem>>, %arg7: memref<1x256xf32, #tpu.memory_space<vmem>>, %arg8: memref<256x128xf32, #tpu.memory_space<vmem>>, %arg9: memref<1x128xf32, #tpu.memory_space<vmem>>, %arg10: memref<8x128xf32, #tpu.memory_space<vmem>>) attributes {dimension_semantics = [#tpu.dimension_semantics<parallel>], iteration_bounds = array<i64: 2>, scalar_prefetch = 0 : i64, scratch_operands = 0 : i64, tpu.core_type = #tpu.core_type<tc>, window_params = [{transform_indices = @transform_0, window_bounds = array<i64: 8, 32>}, {pipeline_mode = #tpu.pipeline_mode<synchronous>, transform_indices = @transform_1, window_bounds = array<i64: 32, 128>}, {pipeline_mode = #tpu.pipeline_mode<synchronous>, transform_indices = @transform_2, window_bounds = array<i64: 1, 128>}, {pipeline_mode = #tpu.pipeline_mode<synchronous>, transform_indices = @transform_3, window_bounds = array<i64: 128, 512>}, {pipeline_mode = #tpu.pipeline_mode<synchronous>, transform_indices = @transform_4, window_bounds = array<i64: 1, 512>}, {pipeline_mode = #tpu.pipeline_mode<synchronous>, transform_indices = @transform_5, window_bounds = array<i64: 512, 256>}, {pipeline_mode = #tpu.pipeline_mode<synchronous>, transform_indices = @transform_6, window_bounds = array<i64: 1, 256>}, {pipeline_mode = #tpu.pipeline_mode<synchronous>, transform_indices = @transform_7, window_bounds = array<i64: 256, 128>}, {pipeline_mode = #tpu.pipeline_mode<synchronous>, transform_indices = @transform_8, window_bounds = array<i64: 1, 128>}, {transform_indices = @transform_9, window_bounds = array<i64: 8, 128>}]} {
    %c0 = arith.constant 0 : index
    %c0_0 = arith.constant 0 : index
    %0 = vector.load %arg1[%c0, %c0_0] : memref<8x32xf32, #tpu.memory_space<vmem>>, vector<8x32xf32>
    %c0_1 = arith.constant 0 : index
    %c0_2 = arith.constant 0 : index
    %1 = vector.load %arg2[%c0_1, %c0_2] : memref<32x128xf32, #tpu.memory_space<vmem>>, vector<32x128xf32>
    %cst = arith.constant dense<0.000000e+00> : vector<8x128xf32>
    %2 = tpu.matmul %0, %1, %cst {dimension_numbers = #tpu.dot_dimension_numbers<[1], [0], [0], [1], [0, 0, 1, 1], [], []>} : vector<8x32xf32>, vector<32x128xf32>, vector<8x128xf32> -> vector<8x128xf32>
    %c0_3 = arith.constant 0 : index
    %c0_4 = arith.constant 0 : index
    %3 = vector.load %arg3[%c0_3, %c0_4] : memref<1x128xf32, #tpu.memory_space<vmem>>, vector<1x128xf32>
    %4 = vector.broadcast %3 : vector<1x128xf32> to vector<8x128xf32>
    %5 = arith.addf %2, %4 : vector<8x128xf32>
    %cst_5 = arith.constant 0.000000e+00 : f32
    %6 = vector.broadcast %cst_5 : f32 to vector<8x128xf32>
    %7 = arith.maximumf %5, %6 : vector<8x128xf32>
    %c0_6 = arith.constant 0 : index
    %c0_7 = arith.constant 0 : index
    %8 = vector.load %arg4[%c0_6, %c0_7] : memref<128x512xf32, #tpu.memory_space<vmem>>, vector<128x512xf32>
    %cst_8 = arith.constant dense<0.000000e+00> : vector<8x512xf32>
    %9 = tpu.matmul %7, %8, %cst_8 {dimension_numbers = #tpu.dot_dimension_numbers<[1], [0], [0], [1], [0, 0, 1, 1], [], []>} : vector<8x128xf32>, vector<128x512xf32>, vector<8x512xf32> -> vector<8x512xf32>
    %c0_9 = arith.constant 0 : index
    %c0_10 = arith.constant 0 : index
    %10 = vector.load %arg5[%c0_9, %c0_10] : memref<1x512xf32, #tpu.memory_space<vmem>>, vector<1x512xf32>
    %11 = vector.broadcast %10 : vector<1x512xf32> to vector<8x512xf32>
    %12 = arith.addf %9, %11 : vector<8x512xf32>
    %cst_11 = arith.constant 0.000000e+00 : f32
    %13 = vector.broadcast %cst_11 : f32 to vector<8x512xf32>
    %14 = arith.maximumf %12, %13 : vector<8x512xf32>
    %c0_12 = arith.constant 0 : index
    %c0_13 = arith.constant 0 : index
    %15 = vector.load %arg6[%c0_12, %c0_13] : memref<512x256xf32, #tpu.memory_space<vmem>>, vector<512x256xf32>
    %cst_14 = arith.constant dense<0.000000e+00> : vector<8x256xf32>
    %16 = tpu.matmul %14, %15, %cst_14 {dimension_numbers = #tpu.dot_dimension_numbers<[1], [0], [0], [1], [0, 0, 1, 1], [], []>} : vector<8x512xf32>, vector<512x256xf32>, vector<8x256xf32> -> vector<8x256xf32>
    %c0_15 = arith.constant 0 : index
    %c0_16 = arith.constant 0 : index
    %17 = vector.load %arg7[%c0_15, %c0_16] : memref<1x256xf32, #tpu.memory_space<vmem>>, vector<1x256xf32>
    %18 = vector.broadcast %17 : vector<1x256xf32> to vector<8x256xf32>
    %19 = arith.addf %16, %18 : vector<8x256xf32>
    %cst_17 = arith.constant 0.000000e+00 : f32
    %20 = vector.broadcast %cst_17 : f32 to vector<8x256xf32>
    %21 = arith.maximumf %19, %20 : vector<8x256xf32>
    %c0_18 = arith.constant 0 : index
    %c0_19 = arith.constant 0 : index
    %22 = vector.load %arg8[%c0_18, %c0_19] : memref<256x128xf32, #tpu.memory_space<vmem>>, vector<256x128xf32>
    %cst_20 = arith.constant dense<0.000000e+00> : vector<8x128xf32>
    %23 = tpu.matmul %21, %22, %cst_20 {dimension_numbers = #tpu.dot_dimension_numbers<[1], [0], [0], [1], [0, 0, 1, 1], [], []>} : vector<8x256xf32>, vector<256x128xf32>, vector<8x128xf32> -> vector<8x128xf32>
    %c0_21 = arith.constant 0 : index
    %c0_22 = arith.constant 0 : index
    %24 = vector.load %arg9[%c0_21, %c0_22] : memref<1x128xf32, #tpu.memory_space<vmem>>, vector<1x128xf32>
    %25 = vector.broadcast %24 : vector<1x128xf32> to vector<8x128xf32>
    %26 = arith.addf %23, %25 : vector<8x128xf32>
    %27 = math.tanh %26 : vector<8x128xf32>
    %c0_23 = arith.constant 0 : index
    %c0_24 = arith.constant 0 : index
    %28 = vector.load %arg10[%c0_23, %c0_24] : memref<8x128xf32, #tpu.memory_space<vmem>>, vector<8x128xf32>
    tpu.vector_store %arg10[%c0_23, %c0_24], %27 {strides = array<i32>} : memref<8x128xf32, #tpu.memory_space<vmem>>, vector<8x128xf32>,
    return
  }
  func.func @transform_0(%arg0: i32) -> (i32, i32) {
    %c0_i32 = arith.constant 0 : i32
    %c0_i32_0 = arith.constant 0 : i32
    return %arg0, %c0_i32 : i32, i32
  }
  func.func @transform_1(%arg0: i32) -> (i32, i32) {
    %c0_i32 = arith.constant 0 : i32
    %c0_i32_0 = arith.constant 0 : i32
    %c0_i32_1 = arith.constant 0 : i32
    return %c0_i32, %c0_i32_0 : i32, i32
  }
  func.func @transform_2(%arg0: i32) -> (i32, i32) {
    %c0_i32 = arith.constant 0 : i32
    %c0_i32_0 = arith.constant 0 : i32
    %c0_i32_1 = arith.constant 0 : i32
    return %c0_i32, %c0_i32_0 : i32, i32
  }
  func.func @transform_3(%arg0: i32) -> (i32, i32) {
    %c0_i32 = arith.constant 0 : i32
    %c0_i32_0 = arith.constant 0 : i32
    %c0_i32_1 = arith.constant 0 : i32
    return %c0_i32, %c0_i32_0 : i32, i32
  }
  func.func @transform_4(%arg0: i32) -> (i32, i32) {
    %c0_i32 = arith.constant 0 : i32
    %c0_i32_0 = arith.constant 0 : i32
    %c0_i32_1 = arith.constant 0 : i32
    return %c0_i32, %c0_i32_0 : i32, i32
  }
  func.func @transform_5(%arg0: i32) -> (i32, i32) {
    %c0_i32 = arith.constant 0 : i32
    %c0_i32_0 = arith.constant 0 : i32
    %c0_i32_1 = arith.constant 0 : i32
    return %c0_i32, %c0_i32_0 : i32, i32
  }
  func.func @transform_6(%arg0: i32) -> (i32, i32) {
    %c0_i32 = arith.constant 0 : i32
    %c0_i32_0 = arith.constant 0 : i32
    %c0_i32_1 = arith.constant 0 : i32
    return %c0_i32, %c0_i32_0 : i32, i32
  }
  func.func @transform_7(%arg0: i32) -> (i32, i32) {
    %c0_i32 = arith.constant 0 : i32
    %c0_i32_0 = arith.constant 0 : i32
    %c0_i32_1 = arith.constant 0 : i32
    return %c0_i32, %c0_i32_0 : i32, i32
  }
  func.func @transform_8(%arg0: i32) -> (i32, i32) {
    %c0_i32 = arith.constant 0 : i32
    %c0_i32_0 = arith.constant 0 : i32
    %c0_i32_1 = arith.constant 0 : i32
    return %c0_i32, %c0_i32_0 : i32, i32
  }
  func.func @transform_9(%arg0: i32) -> (i32, i32) {
    %c0_i32 = arith.constant 0 : i32
    %c0_i32_0 = arith.constant 0 : i32
    return %arg0, %c0_i32 : i32, i32
  }
}

</mosaic_0001>

<bundles_post_ra>
// kernel: tpu_custom_call.1
= control target key start
LH: loop header
LB: loop body
LE: loop exit
PB: predicated region body
PF: predicated region fallthrough
CT: control target
= control target key end

     0   :  { %s1931_s0 = inlined_call_operand.hbm [shape: f32[16,32], index: 0, kind: input, shape index: {}]   ;;  %s1932_s1 = inlined_call_operand.hbm [shape: f32[32,128], index: 1, kind: input, shape index: {}]   ;;  %s1933_s2 = inlined_call_operand.vmem [shape: f32[1,128], index: 2, kind: input, shape index: {}]   ;;  %s1934_s3 = inlined_call_operand.hbm [shape: f32[128,512], index: 3, kind: input, shape index: {}]   ;;  %s1935_s4 = inlined_call_operand.vmem [shape: f32[1,512], index: 4, kind: input, shape index: {}]   ;;  %s1936_s5 = inlined_call_operand.hbm [shape: f32[512,256], index: 5, kind: input, shape index: {}]   ;;  %s1937_s6 = inlined_call_operand.vmem [shape: f32[1,256], index: 6, kind: input, shape index: {}]   ;;  %s1938_s7 = inlined_call_operand.hbm [shape: f32[256,128], index: 7, kind: input, shape index: {}]   ;;  %s1939_s8 = inlined_call_operand.vmem [shape: f32[1,128], index: 8, kind: input, shape index: {}]   ;;  %s1940_s9 = inlined_call_operand.hbm [shape: f32[16,128], index: 9, kind: output, shape index: {}]  }
   0x1   :  { %1945 = sst [smem:[#allocation16_spill]] %s1932_s1 }
   0x2   :  { %1946 = sst [smem:[#allocation17_spill]] %s1934_s3 }
   0x3   :  { %1947 = sst [smem:[#allocation18_spill]] %s1936_s5 }
   0x4   :  { %1948 = sst [smem:[#allocation19_spill]] %s1938_s7 }
   0x5   :  { %14 = vsyncpa [#allocation3], 0 }
   0x6   :  { %16 = vsyncpa [#allocation3 + $0x1], 0 }
   0x7   :  { %17 = vsyncpa [#allocation6], 0 }
   0x8   :  { %18 = vsyncpa [#allocation9], 0 }
   0x9   :  { %19 = vsyncpa [#allocation4], 0 }
   0xa   :  { %21 = vsyncpa [#allocation4 + $0x1], 0  ;;  %s1683_s30 = smov 0   ;;  %s1685_s10 = smov 0  }
   0xb   :  { %s1687_s11 = smov 0   ;;  %s1689_s12 = smov 0  }
   0xc LB: > { %s1619_s13 = smov [#allocation5]   ;;  %s1704_s15 = sadd.s32 4294967295, %s1617_s12   ;;  %s1617_s12 = sphi %s1689_s12, %s1972_s12   ;;  %s1613_s11 = sphi %s1687_s11, %s1971_s11   ;;  %s1609_s10 = sphi %s1685_s10, %s1970_s10   ;;  %s1605_s30 = sphi %s1683_s30, %s1969_s30  }
   0xd   : > { %s264_s14 = sshll.u32 %s1619_s13, 4  ;;  %p1243_p0 = scmp.ge.s32.totalorder %s1617_s12, 1  ;;  %s265_s14 = int_to_ptr.vmem [resolvable:$true] %s264_s14 }
   0xe   : > { %p1941_p1 = scmp.eq.s32.totalorder %s1704_s15, 0  ;;  %p252_p2 = scmp.lt.s32.totalorder %s1617_s12, 3 }
   0xf   : > { %s1620_s17 = smov [#allocation8]   ;;  %s1621_s20 = smov [#allocation7]  }
  0x10   : > { %p1709_p3 = pnand %p1243_p0, %p252_p2  ;;  %s296_s18 = sshll.u32 %s1620_s17, 4  ;;  %s1722_s18 = int_to_ptr.vmem [resolvable:$true] %s296_s18 }
  0x11   : > { %s1724_s21 = sshll.u32 %s1621_s20, 4  ;;  %s1424_s22 = scalar_lea.vmem %s265_s14, 512  ;;  %s281_s21 = int_to_ptr.vmem [resolvable:$true] %s1724_s21 }
  0x12   : > { %s1949_s16 = scalar_select %p1709_p3, 1, 0 }
  0x13   : > { %p1336_p5 = pneg %p1709_p3  ;;  %p1425_p8 = scmp.ne.s32.totalorder %s265_s14, %s1424_s22 }
  0x14   : > { %p1432_p11 = scmp.lt.s32.totalorder %s265_s14, %s265_s14  ;;  %p1433_p12 = scmp.lt.s32.totalorder %s1424_s22, %s1424_s22 }
  0x15   : > { %p1718_p6 = pnand %p1336_p5, %p1941_p1 }
  0x16   : > { %p1434_p13 = por %p1433_p12, %p1432_p11 }
  0x17   : > { %p1415_p7 = pneg %p1718_p6 }
  0x19   : > { %p1427_p9 = pnand %p1425_p8, %p1415_p7 }
  0x1b   : > { %p1428_p10 = pneg %p1427_p9 }
  0x1d   : > { %p1435_p0 = pnand %p1434_p13, %p1428_p10 }
  0x1f   : > { %1438 = shalt.err (!%p1435_p0)
}
  0x20   : > { %s1622_s23 = smov 128   ;;  %s1623_s24 = smov 8  }
  0x21   : > { %s1951_s1 = sld [smem:[#allocation16_spill]]  ;;  %s1450_s27 = scalar_lea.vmem %s1722_s18, 16384 }
  0x22   : > { %p1451_p2 = scmp.ne.s32.totalorder %s1722_s18, %s1450_s27  ;;  %p1458_p9 = scmp.lt.s32.totalorder %s1722_s18, %s1722_s18 }
  0x23   : > { %p1459_p10 = scmp.lt.s32.totalorder %s1450_s27, %s1450_s27 }
  0x24   : > { %p1453_p5 = pnand %p1451_p2, %p1415_p7 }
  0x25   : > { %p1460_p11 = por %p1459_p10, %p1458_p9 }
  0x26   : > { %p1454_p8 = pneg %p1453_p5 }
  0x27   : > { %1339 = dma.hbm_to_vmem [thread:$0]  (!%p1718_p6), %s1951_s1, 512, %s265_s14, [#allocation6], %s1622_s23, %s1622_s23, %s1623_s24  }
  0x28   : > { %p1461_p12 = pnand %p1460_p11, %p1454_p8 }
  0x2a   : > { %1464 = shalt.err (!%p1461_p12)
}
  0x2b   : > { %s1624_s28 = smov 256   ;;  %s1625_s29 = smov 16  }
  0x2c   : > { %s1952_s5 = sld [smem:[#allocation18_spill]]  ;;  %s1476_s17 = scalar_lea.vmem %s281_s21, 8192 }
  0x2d   : > { %p1477_p13 = scmp.ne.s32.totalorder %s281_s21, %s1476_s17  ;;  %p1484_p5 = scmp.lt.s32.totalorder %s281_s21, %s281_s21 }
  0x2e   : > { %p1485_p8 = scmp.lt.s32.totalorder %s1476_s17, %s1476_s17 }
  0x2f   : > { %p1479_p0 = pnand %p1477_p13, %p1415_p7 }
  0x30   : > { %p1486_p9 = por %p1485_p8, %p1484_p5 }
  0x31   : > { %p1480_p2 = pneg %p1479_p0 }
  0x32   : > { %1345 = dma.hbm_to_vmem [thread:$0]  (!%p1718_p6), %s1952_s5, 16384, %s1722_s18, [#allocation9], %s1624_s28, %s1624_s28, %s1625_s29  }
  0x33   : > { %p1487_p10 = pnand %p1486_p9, %p1480_p2 }
  0x35   : > { %1490 = shalt.err (!%p1487_p10)
}
  0x36   : > { %s1626_s20 = smov 512   ;;  %s1627_s22 = smov 32  }
  0x37   : > { %s1953_s3 = sld [smem:[#allocation17_spill]]  ;;  %s1628_s18 = smov [#allocation10]  }
  0x38   : > { %s312_s27 = sshll.u32 %s1628_s18, 4  ;;  %s313_s27 = int_to_ptr.vmem [resolvable:$true] %s312_s27 }
  0x39   : > { %s1502_s28 = scalar_lea.vmem %s313_s27, 4096  ;;  %p1510_p0 = scmp.lt.s32.totalorder %s313_s27, %s313_s27 }
  0x3a   : > { %p1503_p11 = scmp.ne.s32.totalorder %s313_s27, %s1502_s28  ;;  %p1511_p2 = scmp.lt.s32.totalorder %s1502_s28, %s1502_s28 }
  0x3c   : > { %p1505_p12 = pnand %p1503_p11, %p1415_p7  ;;  %p1512_p5 = por %p1511_p2, %p1510_p0 }
  0x3d   : > { %1342 = dma.hbm_to_vmem [thread:$0]  (!%p1718_p6), %s1953_s3, 8192, %s281_s21, [#allocation6], %s1626_s20, %s1626_s20, %s1627_s22  }
  0x3e   : > { %p1506_p13 = pneg %p1505_p12 }
  0x40   : > { %p1513_p8 = pnand %p1512_p5, %p1506_p13 }
  0x42   : > { %1516 = shalt.err (!%p1513_p8)
}
  0x43   : > { %s1954_s7 = sld [smem:[#allocation19_spill]]  ;;  %s1242_s19 = sadd.s32 4294967294, %s1617_s12  }
  0x44   : > { %s1774_s13 = sadd.s32 1, %s1617_s12   ;;  %s34_s17 = sadd.s32 1, %s1613_s11 }
  0x45   : > { %s31_s14 = ssub.s32 %s1617_s12, %s1774_s13  ;;  %p41_p9 = scmp.ne.s32.totalorder %s1613_s11, %s1609_s10 }
  0x46   : > { %p32_p7 = scmp.eq.s32.totalorder %s31_s14, 0  ;;  %p42_p10 = scmp.eq.s32.totalorder %s1617_s12, 0 }
  0x47   : > { %p47_p11 = scmp.ne.s32.totalorder %s1609_s10, %s1605_s30  ;;  %p239_p13 = scmp.eq.s32.totalorder %s1704_s15, 1 }
  0x48   : > { %s1785_s20 = scalar_select %p32_p7, %s1613_s11, %s34_s17  }
  0x49   : > { %1348 = dma.hbm_to_vmem [thread:$0]  (!%p1718_p6), %s1954_s7, 4096, %s313_s27, [#allocation9], %s1622_s23, %s1622_s23, %s1623_s24  }
  0x4a   : > { %p1787_p12 = por %p42_p10, %p41_p9  ;;  %p1793_p6 = por %p1941_p1, %p47_p11 }
  0x4b   : > { %p245_p0 = scmp.eq.s32.totalorder %s1242_s19, 1  ;;  %p1361_p2 = scmp.lt.s32.totalorder %s1617_s12, 2 }
  0x4c   : > { %s1956_s23 = scalar_select %p1793_p6, 1, 0 }
  0x4d   : > { %s329_s24 = sand.u32 1, %s1613_s11   ;;  %p1800_p5 = por %p239_p13, %p41_p9 }
  0x4e   : > { %p1804_p8 = por %p245_p0, %p47_p11  ;;  %s1249_s18 = sshll.u32 %s329_s24, 3 }
  0x4f   : > { %s1957_s25 = scalar_select %p1800_p5, 1, 0 }
  0x50   : > { %s1958_s26 = scalar_select %p1804_p8, 1, 0 }
  0x51   : > { %s1250_s27 = sshll.u32 %s1617_s12, 7  ;;  %s333_s19 = scalar_lea.vmem [#allocation2], %s1249_s18 }
  0x52   : > { %s1812_s29 = scalar_lea.hbm %s1931_s0, %s1250_s27  ;;  %s340_s14 = sshll.u32 %s333_s19, 4  ;;  %s341_s14 = int_to_ptr.vmem [resolvable:$true] %s340_s14 }
  0x53   : > { %p1816_p7 = pnand %p1361_p2, %p1787_p12  ;;  %s330_s1 = scalar_lea.sflag [#allocation3], %s329_s24 }
  0x54   : > { %s1517_s3 = scalar_lea.hbm %s1812_s29, 128  ;;  %s1522_s21 = scalar_lea.hbm %s1931_s0, 256 }
  0x55   : > { %p1518_p9 = scmp.ne.s32.totalorder %s1812_s29, %s1517_s3  ;;  %p1519_p10 = pneg %p1816_p7 }
  0x56   : > { %p1523_p0 = scmp.lt.s32.totalorder %s1812_s29, %s1931_s0  ;;  %p1524_p12 = scmp.lt.s32.totalorder %s1522_s21, %s1517_s3 }
  0x57   : > { %p1520_p11 = pnand %p1519_p10, %p1518_p9 }
  0x58   : > { %p1525_p2 = por %p1524_p12, %p1523_p0 }
  0x59   : > { %p1521_p13 = pneg %p1520_p11 }
  0x5b   : > { %p1526_p4 = pnand %p1525_p2, %p1521_p13 }
  0x5d   : > { %1529 = shalt.err (!%p1526_p4)
}
  0x5e   : > { %s1530_s22 = scalar_lea.vmem %s341_s14, 128  ;;  %s1629_s24 = smov [#allocation2]  }
  0x5f   : > { %p1531_p1 = scmp.ne.s32.totalorder %s341_s14, %s1530_s22  ;;  %s1535_s5 = sshll.u32 %s1629_s24, 4  ;;  %s1536_s5 = int_to_ptr.vmem [resolvable:$false] %s1535_s5 }
  0x60   : > { %s1537_s7 = scalar_lea.vmem %s1536_s5, 256  ;;  %p1538_p9 = scmp.lt.s32.totalorder %s341_s14, %s1536_s5 }
  0x61   : > { %p1533_p8 = pnand %p1531_p1, %p1519_p10  ;;  %p1539_p11 = scmp.lt.s32.totalorder %s1537_s7, %s1530_s22 }
  0x63   : > { %p1534_p5 = pneg %p1533_p8  ;;  %p1540_p6 = por %p1539_p11, %p1538_p9 }
  0x65   : > { %p1541_p3 = pnand %p1540_p6, %p1534_p5 }
  0x67   : > { %1544 = shalt.err (!%p1541_p3)
}
  0x68   : > { %1352 = dma.hbm_to_vmem [thread:$0]  (!%p1816_p7), %s1812_s29, 128, %s341_s14, %s330_s1  }
  0x69   : > { %p1960_p13 = scmp.ne.s32.totalorder %s1949_s16, 0 }
  0x6a   : > { %s1837_s3 = sand.u32 (!%p1960_p13), 1, %s1609_s10   ;;  %p1961_p1 = scmp.ne.s32.totalorder (!%p1960_p13), %s1956_s23, 0 }
  0x6b   : > { %349 = sbr.rel (%p1960_p13) target bundleno = 953 (0x3b9), region = 56  ;;  %s1252_s27 = sshll.u32 (!%p1960_p13), %s1837_s3, 3 }
  0x6c   : > { %s352_s5 = scalar_lea.sflag (!%p1960_p13), [#allocation3], %s1837_s3  ;;  %s355_s7 = scalar_lea.vmem (!%p1960_p13), [#allocation2], %s1252_s27 }
  0x70   : > { %1588 = dma.done.wait (%p1961_p1), %s352_s5, 128  }
  0x71   : > { %1590 = vsyncadd (%p1961_p1), %s352_s5, 4294967168  ;;  %p1962_p3 = scmp.eq.s32.totalorder %s1704_s15, 0 }
  0x73   : > { %1592 = dma.done.wait (%p1962_p3), [#allocation6], 8704   ;;  %p1963_p4 = pmov %p1962_p3 }
  0x74   : > { %p1964_p6 = pmov %p1962_p3 }
  0x75   : > { %1594 = vsyncadd (%p1963_p4), [#allocation6], 4294958592 }
  0x76   : > { %1596 = dma.done.wait (%p1964_p6), [#allocation9], 20480   ;;  %p1965_p5 = pmov %p1962_p3 }
  0x77   : > { %v1630_v0 = vmov 0.0   ;;  %vm1631_vm0 = vmmov 0   ;;  %v410_v1 = vld [vmem:[#allocation5 + $0x18] sm:$0xff]  ;;  %v409_v2 = vld [vmem:[#allocation5 + $0x10] sm:$0xff]  ;;  %v554_v3 = vld [vmem:[#allocation7 + $0x1e8] sm:$0xff]  ;;  %vm418_vm1 = vcmask 261120  }
  0x78   : > { %1598 = vsyncadd (%p1965_p5), [#allocation9], 4294946816  ;;  %1305 = vmatprep.subr.mxu0 %v1630_v0  ;;  %1313 = vmatprep.mubr.msk.f32.mxu0 %vm1631_vm0, %v1630_v0  ;;  %v408_v4 = vld [vmem:[#allocation5 + $0x8] sm:$0xff]  ;;  %v553_v5 = vld [vmem:[#allocation7 + $0x1e0] sm:$0xff]  ;;  %s1262_s18 = sshll.u32 %s1704_s15, 7  ;;  %s405_s19 = scalar_lea.vmem [#allocation11], %s1252_s27 }
  0x79   : > { %643 = vmatprep.mubr.f32.mxu1 %v1630_v0  ;;  %1306 = vmatpush3.msra.mxu0 %v410_v1  ;;  %v550_v6 = vld [vmem:[#allocation7 + $0x1c8] sm:$0xff]  ;;  %v549_v7 = vld [vmem:[#allocation7 + $0x1c0] sm:$0xff]  ;;  %v406_v10 = vld [vmem:[%s355_s7] sm:$0xff]  ;;  %s1134_s22 = sshll.u32 %s405_s19, 4  ;;  %s1894_s7 = scalar_lea.hbm %s1940_s9, %s1262_s18  ;;  %s1135_s22 = int_to_ptr.vmem [resolvable:$true] %s1134_s22 }
  0x7a   : > { %1307 = vmatprep.subr.mxu0 %v1630_v0  ;;  %579 = vmatprep.subr.mxu1 %v554_v3  ;;  %v407_v8 = vld [vmem:[#allocation5] sm:$0xff]  ;;  %v546_v9 = vld [vmem:[#allocation7 + $0x1a8] sm:$0xff]  ;;  %v556_v11 = vld [vmem:[#allocation7 + $0x1f8] sm:$0xff]  ;;  %s1121_s1 = scalar_lea.sflag [#allocation4], %s1837_s3  ;;  %s1545_s16 = scalar_lea.vmem %s1135_s22, 128 }
  0x7b   : > { %1308 = vmatpush3.msra.mxu0 %v409_v2  ;;  %580 = vmatpush1.msra.mxu1 %v553_v5  ;;  %v545_v12 = vld [vmem:[#allocation7 + $0x1a0] sm:$0xff]  ;;  %v555_v13 = vld [vmem:[#allocation7 + $0x1f0] sm:$0xff]  ;;  %v542_v14 = vld [vmem:[#allocation7 + $0x188] sm:$0xff]  ;;  %p1546_p8 = scmp.ne.s32.totalorder %s1135_s22, %s1545_s16  ;;  %p1966_p7 = scmp.ne.s32.totalorder %s1957_s25, 0 }
  0x7c   : > { %1309 = vmatprep.subr.mxu0 %v1630_v0  ;;  %581 = vmatprep.subr.mxu1 %v550_v6  ;;  %v552_v15 = vld [vmem:[#allocation7 + $0x1d8] sm:$0xff]  ;;  %v541_v16 = vld [vmem:[#allocation7 + $0x180] sm:$0xff]  ;;  %v551_v17 = vld [vmem:[#allocation7 + $0x1d0] sm:$0xff]  ;;  %s1632_s23 = smov [#allocation11]  }
  0x7d   : > { %1310 = vmatpush3.msra.mxu0 %v408_v4  ;;  %582 = vmatpush1.msra.mxu1 %v549_v7  ;;  %v538_v18 = vld [vmem:[#allocation7 + $0x168] sm:$0xff]  ;;  %v548_v19 = vld [vmem:[#allocation7 + $0x1b8] sm:$0xff]  ;;  %v537_v20 = vld [vmem:[#allocation7 + $0x160] sm:$0xff]  ;;  %p1547_p10 = pnand %p1546_p8, %p1966_p7  ;;  %s1549_s29 = sshll.u32 %s1632_s23, 4  ;;  %s1550_s29 = int_to_ptr.vmem [resolvable:$false] %s1549_s29 }
  0x7e   : > { %1311 = vmatprep.subr.mxu0 %v1630_v0  ;;  %583 = vmatprep.subr.mxu1 %v546_v9  ;;  %v547_v21 = vld [vmem:[#allocation7 + $0x1b0] sm:$0xff]  ;;  %v534_v22 = vld [vmem:[#allocation7 + $0x148] sm:$0xff]  ;;  %v544_v23 = vld [vmem:[#allocation7 + $0x198] sm:$0xff]  ;;  %s1551_s15 = scalar_lea.vmem %s1550_s29, 256  ;;  %p1552_p12 = scmp.lt.s32.totalorder %s1135_s22, %s1550_s29 }
  0x7f   : > { %1312 = vmatpush3.msra.mxu0 %v407_v8  ;;  %584 = vmatpush1.msra.mxu1 %v545_v12  ;;  %v533_v24 = vld [vmem:[#allocation7 + $0x140] sm:$0xff]  ;;  %v543_v25 = vld [vmem:[#allocation7 + $0x190] sm:$0xff]  ;;  %v530_v26 = vld [vmem:[#allocation7 + $0x128] sm:$0xff]  ;;  %p1548_p0 = pneg %p1547_p10  ;;  %p1553_p2 = scmp.lt.s32.totalorder %s1551_s15, %s1545_s16 }
  0x80   : > { %1314 = vmatmul.mubr.msk.f32.vlgmr.msra.gmra.mxu0 %vm418_vm1, %v406_v10  ;;  %650 = vmatprep.subr.mxu0 %v556_v11  ;;  %v540_v27 = vld [vmem:[#allocation7 + $0x178] sm:$0xff]  ;;  %v529_v28 = vld [vmem:[#allocation7 + $0x120] sm:$0xff]  ;;  %v539_v29 = vld [vmem:[#allocation7 + $0x170] sm:$0xff] }
  0x81   : > { %651 = vmatpush1.msra.mxu0 %v555_v13  ;;  %585 = vmatprep.subr.mxu1 %v542_v14  ;;  %v526_v30 = vld [vmem:[#allocation7 + $0x108] sm:$0xff]  ;;  %v536_v31 = vld [vmem:[#allocation7 + $0x158] sm:$0xff]  ;;  %v525_v32 = vld [vmem:[#allocation7 + $0x100] sm:$0xff]  ;;  %p1554_p9 = por %p1553_p2, %p1552_p12 }
  0x82   : > { %652 = vmatprep.subr.mxu0 %v552_v15  ;;  %586 = vmatpush1.msra.mxu1 %v541_v16  ;;  %v535_v33 = vld [vmem:[#allocation7 + $0x150] sm:$0xff]  ;;  %v522_v34 = vld [vmem:[#allocation7 + $0xe8] sm:$0xff]  ;;  %v532_v35 = vld [vmem:[#allocation7 + $0x138] sm:$0xff] }
  0x83   : > { %653 = vmatpush1.msra.mxu0 %v551_v17  ;;  %587 = vmatprep.subr.mxu1 %v538_v18  ;;  %v521_v36 = vld [vmem:[#allocation7 + $0xe0] sm:$0xff]  ;;  %v531_v37 = vld [vmem:[#allocation7 + $0x130] sm:$0xff]  ;;  %v518_v38 = vld [vmem:[#allocation7 + $0xc8] sm:$0xff]  ;;  %p1555_p11 = pnand %p1554_p9, %p1548_p0 }
  0x84   : > { %654 = vmatprep.subr.mxu0 %v548_v19  ;;  %588 = vmatpush1.msra.mxu1 %v537_v20  ;;  %v528_v39 = vld [vmem:[#allocation7 + $0x118] sm:$0xff]  ;;  %v517_v40 = vld [vmem:[#allocation7 + $0xc0] sm:$0xff]  ;;  %v527_v41 = vld [vmem:[#allocation7 + $0x110] sm:$0xff] }
  0x85   : > { %655 = vmatpush1.msra.mxu0 %v547_v21  ;;  %589 = vmatprep.subr.mxu1 %v534_v22  ;;  %v514_v42 = vld [vmem:[#allocation7 + $0xa8] sm:$0xff]  ;;  %v524_v43 = vld [vmem:[#allocation7 + $0xf8] sm:$0xff]  ;;  %v513_v44 = vld [vmem:[#allocation7 + $0xa0] sm:$0xff] }
  0x86   : > { %656 = vmatprep.subr.mxu0 %v544_v23  ;;  %590 = vmatpush1.msra.mxu1 %v533_v24  ;;  %v523_v45 = vld [vmem:[#allocation7 + $0xf0] sm:$0xff]  ;;  %v510_v46 = vld [vmem:[#allocation7 + $0x88] sm:$0xff]  ;;  %v520_v47 = vld [vmem:[#allocation7 + $0xd8] sm:$0xff] }
  0x87   : > { %657 = vmatpush1.msra.mxu0 %v543_v25  ;;  %591 = vmatprep.subr.mxu1 %v530_v26  ;;  %v509_v48 = vld [vmem:[#allocation7 + $0x80] sm:$0xff]  ;;  %v519_v49 = vld [vmem:[#allocation7 + $0xd0] sm:$0xff]  ;;  %v506_v50 = vld [vmem:[#allocation7 + $0x68] sm:$0xff] }
  0x88   : > { %658 = vmatprep.subr.mxu0 %v540_v27  ;;  %592 = vmatpush1.msra.mxu1 %v529_v28  ;;  %v516_v51 = vld [vmem:[#allocation7 + $0xb8] sm:$0xff]  ;;  %v505_v52 = vld [vmem:[#allocation7 + $0x60] sm:$0xff]  ;;  %v515_v53 = vld [vmem:[#allocation7 + $0xb0] sm:$0xff] }
  0x89   : > { %659 = vmatpush1.msra.mxu0 %v539_v29  ;;  %593 = vmatprep.subr.mxu1 %v526_v30  ;;  %v502_v54 = vld [vmem:[#allocation7 + $0x48] sm:$0xff]  ;;  %v512_v55 = vld [vmem:[#allocation7 + $0x98] sm:$0xff]  ;;  %v511_v56 = vld [vmem:[#allocation7 + $0x90] sm:$0xff] }
  0x8a   : > { %660 = vmatprep.subr.mxu0 %v536_v31  ;;  %594 = vmatpush1.msra.mxu1 %v525_v32  ;;  %v508_v57 = vld [vmem:[#allocation7 + $0x78] sm:$0xff]  ;;  %v507_v58 = vld [vmem:[#allocation7 + $0x70] sm:$0xff]  ;;  %v501_v60 = vld [vmem:[#allocation7 + $0x40] sm:$0xff] }
  0x8b   : > { %661 = vmatpush1.msra.mxu0 %v535_v33  ;;  %595 = vmatprep.subr.mxu1 %v522_v34  ;;  %v504_v59 = vld [vmem:[#allocation7 + $0x58] sm:$0xff]  ;;  %v503_v61 = vld [vmem:[#allocation7 + $0x50] sm:$0xff]  ;;  %v498_v62 = vld [vmem:[#allocation7 + $0x28] sm:$0xff] }
  0x8c   : > { %662 = vmatprep.subr.mxu0 %v532_v35  ;;  %596 = vmatpush1.msra.mxu1 %v521_v36  ;;  %v500_v63 = vld [vmem:[#allocation7 + $0x38] sm:$0xff]  ;;  %v497_v1 = vld [vmem:[#allocation7 + $0x20] sm:$0xff]  ;;  %v499_v2 = vld [vmem:[#allocation7 + $0x30] sm:$0xff] }
  0x8d   : > { %663 = vmatpush1.msra.mxu0 %v531_v37  ;;  %597 = vmatprep.subr.mxu1 %v518_v38  ;;  %v494_v3 = vld [vmem:[#allocation7 + $0x8] sm:$0xff]  ;;  %v496_v4 = vld [vmem:[#allocation7 + $0x18] sm:$0xff]  ;;  %v495_v5 = vld [vmem:[#allocation7 + $0x10] sm:$0xff] }
  0x8e   : > { %664 = vmatprep.subr.mxu0 %v528_v39  ;;  %598 = vmatpush1.msra.mxu1 %v517_v40  ;;  %v756_v6 = vld [vmem:[#allocation8 + $0xf8] sm:$0xff]  ;;  %v1258_v8 = vld [vmem:[%s1933_s2] ss:$0 sm:$0xff]  ;;  %v754_v15 = vld [vmem:[#allocation8 + $0xe8] sm:$0xff] }
  0x8f   : > { %665 = vmatpush1.msra.mxu0 %v527_v41  ;;  %599 = vmatprep.subr.mxu1 %v514_v42  ;;  %v820_v7 = vld [vmem:[#allocation8 + $0x2f8] sm:$0xff]  ;;  %v755_v13 = vld [vmem:[#allocation8 + $0xf0] sm:$0xff]  ;;  %v818_v16 = vld [vmem:[#allocation8 + $0x2e8] sm:$0xff] }
  0x90   : > { %666 = vmatprep.subr.mxu0 %v524_v43  ;;  %600 = vmatpush1.msra.mxu1 %v513_v44  ;;  %v819_v14 = vld [vmem:[#allocation8 + $0x2f0] sm:$0xff]  ;;  %v753_v17 = vld [vmem:[#allocation8 + $0xe0] sm:$0xff]  ;;  %v752_v19 = vld [vmem:[#allocation8 + $0xd8] sm:$0xff] }
  0x91   : > { %667 = vmatpush1.msra.mxu0 %v523_v45  ;;  %601 = vmatprep.subr.mxu1 %v510_v46  ;;  %v817_v18 = vld [vmem:[#allocation8 + $0x2e0] sm:$0xff]  ;;  %v816_v20 = vld [vmem:[#allocation8 + $0x2d8] sm:$0xff]  ;;  %v751_v21 = vld [vmem:[#allocation8 + $0xd0] sm:$0xff] }
  0x92   : > { %668 = vmatprep.subr.mxu0 %v520_v47  ;;  %602 = vmatpush1.msra.mxu1 %v509_v48  ;;  %v815_v22 = vld [vmem:[#allocation8 + $0x2d0] sm:$0xff]  ;;  %v750_v23 = vld [vmem:[#allocation8 + $0xc8] sm:$0xff]  ;;  %v749_v25 = vld [vmem:[#allocation8 + $0xc0] sm:$0xff] }
  0x93   : > { %669 = vmatpush1.msra.mxu0 %v519_v49  ;;  %603 = vmatprep.subr.mxu1 %v506_v50  ;;  %v814_v24 = vld [vmem:[#allocation8 + $0x2c8] sm:$0xff]  ;;  %v813_v26 = vld [vmem:[#allocation8 + $0x2c0] sm:$0xff]  ;;  %v748_v27 = vld [vmem:[#allocation8 + $0xb8] sm:$0xff] }
  0x94   : > { %670 = vmatprep.subr.mxu0 %v516_v51  ;;  %604 = vmatpush1.msra.mxu1 %v505_v52  ;;  %v812_v28 = vld [vmem:[#allocation8 + $0x2b8] sm:$0xff]  ;;  %v747_v29 = vld [vmem:[#allocation8 + $0xb0] sm:$0xff]  ;;  %v746_v31 = vld [vmem:[#allocation8 + $0xa8] sm:$0xff] }
  0x95   : > { %671 = vmatpush1.msra.mxu0 %v515_v53  ;;  %605 = vmatprep.subr.mxu1 %v502_v54  ;;  %v811_v30 = vld [vmem:[#allocation8 + $0x2b0] sm:$0xff]  ;;  %v810_v32 = vld [vmem:[#allocation8 + $0x2a8] sm:$0xff]  ;;  %v745_v33 = vld [vmem:[#allocation8 + $0xa0] sm:$0xff] }
  0x96   : > { %672 = vmatprep.subr.mxu0 %v512_v55  ;;  %714 = vmatprep.mubr.f32.mxu0 %v1630_v0  ;;  %v493_v0 = vld [vmem:[#allocation7] sm:$0xff]  ;;  %v744_v35 = vld [vmem:[#allocation8 + $0x98] sm:$0xff]  ;;  %v743_v37 = vld [vmem:[#allocation8 + $0x90] sm:$0xff] }
  0x97   : > { %673 = vmatpush1.msra.mxu0 %v511_v56  ;;  %606 = vmatpush1.msra.mxu1 %v501_v60  ;;  %v809_v34 = vld [vmem:[#allocation8 + $0x2a0] sm:$0xff]  ;;  %v808_v36 = vld [vmem:[#allocation8 + $0x298] sm:$0xff]  ;;  %v807_v38 = vld [vmem:[#allocation8 + $0x290] sm:$0xff] }
  0x98   : > { %674 = vmatprep.subr.mxu0 %v508_v57  ;;  %607 = vmatprep.subr.mxu1 %v498_v62  ;;  %v742_v39 = vld [vmem:[#allocation8 + $0x88] sm:$0xff]  ;;  %v741_v41 = vld [vmem:[#allocation8 + $0x80] sm:$0xff]  ;;  %v740_v43 = vld [vmem:[#allocation8 + $0x78] sm:$0xff] }
  0x99   : > { %675 = vmatpush1.msra.mxu0 %v507_v58  ;;  %608 = vmatpush1.msra.mxu1 %v497_v1  ;;  %v806_v40 = vld [vmem:[#allocation8 + $0x288] sm:$0xff]  ;;  %v805_v42 = vld [vmem:[#allocation8 + $0x280] sm:$0xff]  ;;  %v804_v44 = vld [vmem:[#allocation8 + $0x278] sm:$0xff] }
  0x9a   : > { %676 = vmatprep.subr.mxu0 %v504_v59  ;;  %609 = vmatprep.subr.mxu1 %v494_v3  ;;  %v739_v45 = vld [vmem:[#allocation8 + $0x70] sm:$0xff]  ;;  %v738_v47 = vld [vmem:[#allocation8 + $0x68] sm:$0xff]  ;;  %v737_v49 = vld [vmem:[#allocation8 + $0x60] sm:$0xff] }
  0x9b   : > { %677 = vmatpush1.msra.mxu0 %v503_v61  ;;  %610 = vmatpush1.msra.mxu1 %v493_v0  ;;  %v803_v46 = vld [vmem:[#allocation8 + $0x270] sm:$0xff]  ;;  %v802_v48 = vld [vmem:[#allocation8 + $0x268] sm:$0xff]  ;;  %v801_v50 = vld [vmem:[#allocation8 + $0x260] sm:$0xff] }
  0x9c   : > { %678 = vmatprep.subr.mxu0 %v500_v63  ;;  %865 = vmatprep.subr.mxu1 %v756_v6  ;;  %v736_v51 = vld [vmem:[#allocation8 + $0x58] sm:$0xff]  ;;  %v735_v53 = vld [vmem:[#allocation8 + $0x50] sm:$0xff]  ;;  %v734_v55 = vld [vmem:[#allocation8 + $0x48] sm:$0xff] }
  0x9d   : > { %679 = vmatpush1.msra.mxu0 %v499_v2  ;;  %v800_v52 = vld [vmem:[#allocation8 + $0x258] sm:$0xff]  ;;  %v799_v54 = vld [vmem:[#allocation8 + $0x250] sm:$0xff]  ;;  %v798_v56 = vld [vmem:[#allocation8 + $0x248] sm:$0xff] }
  0x9e   : > { %680 = vmatprep.subr.mxu0 %v496_v4  ;;  %v733_v57 = vld [vmem:[#allocation8 + $0x40] sm:$0xff]  ;;  %v732_v59 = vld [vmem:[#allocation8 + $0x38] sm:$0xff]  ;;  %v731_v61 = vld [vmem:[#allocation8 + $0x30] sm:$0xff] }
  0x9f   : > { %681 = vmatpush1.msra.mxu0 %v495_v5  ;;  %v797_v58 = vld [vmem:[#allocation8 + $0x240] sm:$0xff]  ;;  %v796_v60 = vld [vmem:[#allocation8 + $0x238] sm:$0xff]  ;;  %v795_v62 = vld [vmem:[#allocation8 + $0x230] sm:$0xff] }
  0xa0   : > { %936 = vmatprep.subr.mxu0 %v820_v7  ;;  %v730_v63 = vld [vmem:[#allocation8 + $0x28] sm:$0xff]  ;;  %v729_v2 = vld [vmem:[#allocation8 + $0x20] sm:$0xff]  ;;  %v728_v4 = vld [vmem:[#allocation8 + $0x18] sm:$0xff] }
  0xa1   : > { %v794_v1 = vld [vmem:[#allocation8 + $0x228] sm:$0xff]  ;;  %v793_v3 = vld [vmem:[#allocation8 + $0x220] sm:$0xff]  ;;  %v792_v0 = vld [vmem:[#allocation8 + $0x218] sm:$0xff] }
  0xa2   : > { %v727_v5 = vld [vmem:[#allocation8 + $0x10] sm:$0xff]  ;;  %v726_v7 = vld [vmem:[#allocation8 + $0x8] sm:$0xff] }
  0xa3   : > { %v791_v6 = vld [vmem:[#allocation8 + $0x210] sm:$0xff] }
 0x140   : > { %v488_v9 = vpop.f32.mrf.mxu0 }
 0x141   : > { %v489_v10 = vadd.f32 %v1258_v8, %v488_v9  ;;  %v790_v8 = vld [vmem:[#allocation8 + $0x208] sm:$0xff]  ;;  %v725_v9 = vld [vmem:[#allocation8] sm:$0xff] }
 0x142   : > { %v1315_v11 = vpop.f32.mrf.mxu0 }
 0x143   : > { %v492_v12 = vmax.f32 %v489_v10, 0.0  ;;  %v789_v10 = vld [vmem:[#allocation8 + $0x200] sm:$0xff]  ;;  %v788_v11 = vld [vmem:[#allocation8 + $0x1f8] sm:$0xff] }
 0x145   : > { %644 = vmatmul.mubr.f32.vlgmr.msra.gmra.mxu1 %v492_v12  ;;  %715 = vmatmul.mubr.f32.vlgmr.msra.gmra.mxu0 %v492_v12  ;;  %v852_v12 = vld [vmem:[#allocation8 + $0x3f8] sm:$0xff] }
 0x146   : > { %866 = vmatpush1.msra.mxu1 %v755_v13  ;;  %937 = vmatpush1.msra.mxu0 %v819_v14  ;;  %v787_v13 = vld [vmem:[#allocation8 + $0x1f0] sm:$0xff] }
 0x147   : > { %867 = vmatprep.subr.mxu1 %v754_v15  ;;  %938 = vmatprep.subr.mxu0 %v818_v16  ;;  %v851_v14 = vld [vmem:[#allocation8 + $0x3f0] sm:$0xff]  ;;  %v786_v15 = vld [vmem:[#allocation8 + $0x1e8] sm:$0xff] }
 0x148   : > { %868 = vmatpush1.msra.mxu1 %v753_v17  ;;  %939 = vmatpush1.msra.mxu0 %v817_v18  ;;  %v850_v16 = vld [vmem:[#allocation8 + $0x3e8] sm:$0xff]  ;;  %v785_v17 = vld [vmem:[#allocation8 + $0x1e0] sm:$0xff] }
 0x149   : > { %869 = vmatprep.subr.mxu1 %v752_v19  ;;  %940 = vmatprep.subr.mxu0 %v816_v20  ;;  %v849_v18 = vld [vmem:[#allocation8 + $0x3e0] sm:$0xff]  ;;  %v784_v19 = vld [vmem:[#allocation8 + $0x1d8] sm:$0xff] }
 0x14a   : > { %870 = vmatpush1.msra.mxu1 %v751_v21  ;;  %941 = vmatpush1.msra.mxu0 %v815_v22  ;;  %v848_v20 = vld [vmem:[#allocation8 + $0x3d8] sm:$0xff]  ;;  %v783_v21 = vld [vmem:[#allocation8 + $0x1d0] sm:$0xff] }
 0x14b   : > { %871 = vmatprep.subr.mxu1 %v750_v23  ;;  %942 = vmatprep.subr.mxu0 %v814_v24  ;;  %v847_v22 = vld [vmem:[#allocation8 + $0x3d0] sm:$0xff]  ;;  %v782_v23 = vld [vmem:[#allocation8 + $0x1c8] sm:$0xff] }
 0x14c   : > { %872 = vmatpush1.msra.mxu1 %v749_v25  ;;  %943 = vmatpush1.msra.mxu0 %v813_v26  ;;  %v846_v24 = vld [vmem:[#allocation8 + $0x3c8] sm:$0xff]  ;;  %v781_v25 = vld [vmem:[#allocation8 + $0x1c0] sm:$0xff] }
 0x14d   : > { %873 = vmatprep.subr.mxu1 %v748_v27  ;;  %944 = vmatprep.subr.mxu0 %v812_v28  ;;  %v845_v26 = vld [vmem:[#allocation8 + $0x3c0] sm:$0xff]  ;;  %v780_v27 = vld [vmem:[#allocation8 + $0x1b8] sm:$0xff] }
 0x14e   : > { %874 = vmatpush1.msra.mxu1 %v747_v29  ;;  %945 = vmatpush1.msra.mxu0 %v811_v30  ;;  %v844_v28 = vld [vmem:[#allocation8 + $0x3b8] sm:$0xff]  ;;  %v779_v29 = vld [vmem:[#allocation8 + $0x1b0] sm:$0xff] }
 0x14f   : > { %875 = vmatprep.subr.mxu1 %v746_v31  ;;  %946 = vmatprep.subr.mxu0 %v810_v32  ;;  %v843_v30 = vld [vmem:[#allocation8 + $0x3b0] sm:$0xff]  ;;  %v778_v31 = vld [vmem:[#allocation8 + $0x1a8] sm:$0xff] }
 0x150   : > { %876 = vmatpush1.msra.mxu1 %v745_v33  ;;  %947 = vmatpush1.msra.mxu0 %v809_v34  ;;  %v842_v32 = vld [vmem:[#allocation8 + $0x3a8] sm:$0xff]  ;;  %v777_v33 = vld [vmem:[#allocation8 + $0x1a0] sm:$0xff] }
 0x151   : > { %877 = vmatprep.subr.mxu1 %v744_v35  ;;  %948 = vmatprep.subr.mxu0 %v808_v36  ;;  %v841_v34 = vld [vmem:[#allocation8 + $0x3a0] sm:$0xff]  ;;  %v776_v35 = vld [vmem:[#allocation8 + $0x198] sm:$0xff] }
 0x152   : > { %878 = vmatpush1.msra.mxu1 %v743_v37  ;;  %949 = vmatpush1.msra.mxu0 %v807_v38  ;;  %v840_v36 = vld [vmem:[#allocation8 + $0x398] sm:$0xff]  ;;  %v775_v37 = vld [vmem:[#allocation8 + $0x190] sm:$0xff] }
 0x153   : > { %879 = vmatprep.subr.mxu1 %v742_v39  ;;  %950 = vmatprep.subr.mxu0 %v806_v40  ;;  %v839_v38 = vld [vmem:[#allocation8 + $0x390] sm:$0xff]  ;;  %v774_v39 = vld [vmem:[#allocation8 + $0x188] sm:$0xff] }
 0x154   : > { %880 = vmatpush1.msra.mxu1 %v741_v41  ;;  %951 = vmatpush1.msra.mxu0 %v805_v42  ;;  %v838_v40 = vld [vmem:[#allocation8 + $0x388] sm:$0xff]  ;;  %v773_v41 = vld [vmem:[#allocation8 + $0x180] sm:$0xff] }
 0x155   : > { %881 = vmatprep.subr.mxu1 %v740_v43  ;;  %952 = vmatprep.subr.mxu0 %v804_v44  ;;  %v837_v42 = vld [vmem:[#allocation8 + $0x380] sm:$0xff]  ;;  %v772_v43 = vld [vmem:[#allocation8 + $0x178] sm:$0xff] }
 0x156   : > { %882 = vmatpush1.msra.mxu1 %v739_v45  ;;  %953 = vmatpush1.msra.mxu0 %v803_v46  ;;  %v836_v44 = vld [vmem:[#allocation8 + $0x378] sm:$0xff]  ;;  %v771_v45 = vld [vmem:[#allocation8 + $0x170] sm:$0xff] }
 0x157   : > { %883 = vmatprep.subr.mxu1 %v738_v47  ;;  %954 = vmatprep.subr.mxu0 %v802_v48  ;;  %v835_v46 = vld [vmem:[#allocation8 + $0x370] sm:$0xff]  ;;  %v770_v47 = vld [vmem:[#allocation8 + $0x168] sm:$0xff] }
 0x158   : > { %884 = vmatpush1.msra.mxu1 %v737_v49  ;;  %955 = vmatpush1.msra.mxu0 %v801_v50  ;;  %v834_v48 = vld [vmem:[#allocation8 + $0x368] sm:$0xff]  ;;  %v769_v49 = vld [vmem:[#allocation8 + $0x160] sm:$0xff] }
 0x159   : > { %885 = vmatprep.subr.mxu1 %v736_v51  ;;  %956 = vmatprep.subr.mxu0 %v800_v52  ;;  %v833_v50 = vld [vmem:[#allocation8 + $0x360] sm:$0xff]  ;;  %v768_v51 = vld [vmem:[#allocation8 + $0x158] sm:$0xff] }
 0x15a   : > { %886 = vmatpush1.msra.mxu1 %v735_v53  ;;  %957 = vmatpush1.msra.mxu0 %v799_v54  ;;  %v832_v52 = vld [vmem:[#allocation8 + $0x358] sm:$0xff]  ;;  %v767_v53 = vld [vmem:[#allocation8 + $0x150] sm:$0xff] }
 0x15b   : > { %887 = vmatprep.subr.mxu1 %v734_v55  ;;  %958 = vmatprep.subr.mxu0 %v798_v56  ;;  %v831_v54 = vld [vmem:[#allocation8 + $0x350] sm:$0xff]  ;;  %v766_v55 = vld [vmem:[#allocation8 + $0x148] sm:$0xff] }
 0x15c   : > { %888 = vmatpush1.msra.mxu1 %v733_v57  ;;  %959 = vmatpush1.msra.mxu0 %v797_v58  ;;  %v830_v56 = vld [vmem:[#allocation8 + $0x348] sm:$0xff]  ;;  %v765_v57 = vld [vmem:[#allocation8 + $0x140] sm:$0xff] }
 0x15d   : > { %889 = vmatprep.subr.mxu1 %v732_v59  ;;  %960 = vmatprep.subr.mxu0 %v796_v60  ;;  %v829_v58 = vld [vmem:[#allocation8 + $0x340] sm:$0xff]  ;;  %v764_v59 = vld [vmem:[#allocation8 + $0x138] sm:$0xff] }
 0x15e   : > { %890 = vmatpush1.msra.mxu1 %v731_v61  ;;  %961 = vmatpush1.msra.mxu0 %v795_v62  ;;  %v828_v60 = vld [vmem:[#allocation8 + $0x338] sm:$0xff]  ;;  %v763_v61 = vld [vmem:[#allocation8 + $0x130] sm:$0xff] }
 0x15f   : > { %891 = vmatprep.subr.mxu1 %v730_v63  ;;  %962 = vmatprep.subr.mxu0 %v794_v1  ;;  %v827_v62 = vld [vmem:[#allocation8 + $0x330] sm:$0xff]  ;;  %v762_v63 = vld [vmem:[#allocation8 + $0x128] sm:$0xff] }
 0x160   : > { %892 = vmatpush1.msra.mxu1 %v729_v2  ;;  %963 = vmatpush1.msra.mxu0 %v793_v3  ;;  %v826_v1 = vld [vmem:[#allocation8 + $0x328] sm:$0xff]  ;;  %v761_v2 = vld [vmem:[#allocation8 + $0x120] sm:$0xff] }
 0x161   : > { %893 = vmatprep.subr.mxu1 %v728_v4  ;;  %964 = vmatprep.subr.mxu0 %v792_v0  ;;  %v825_v3 = vld [vmem:[#allocation8 + $0x320] sm:$0xff]  ;;  %v760_v4 = vld [vmem:[#allocation8 + $0x118] sm:$0xff] }
 0x162   : > { %894 = vmatpush1.msra.mxu1 %v727_v5  ;;  %965 = vmatpush1.msra.mxu0 %v791_v6  ;;  %v824_v0 = vld [vmem:[#allocation8 + $0x318] sm:$0xff]  ;;  %v759_v5 = vld [vmem:[#allocation8 + $0x110] sm:$0xff] }
 0x163   : > { %895 = vmatprep.subr.mxu1 %v726_v7  ;;  %966 = vmatprep.subr.mxu0 %v790_v8  ;;  %v823_v6 = vld [vmem:[#allocation8 + $0x310] sm:$0xff]  ;;  %v758_v7 = vld [vmem:[#allocation8 + $0x108] sm:$0xff] }
 0x164   : > { %896 = vmatpush1.msra.mxu1 %v725_v9  ;;  %967 = vmatpush1.msra.mxu0 %v789_v10  ;;  %v822_v8 = vld [vmem:[#allocation8 + $0x308] sm:$0xff]  ;;  %v757_v9 = vld [vmem:[#allocation8 + $0x100] sm:$0xff] }
 0x165   : > { %897 = vmatprep.subr.mxu1 %v788_v11  ;;  %968 = vmatprep.subr.mxu0 %v852_v12  ;;  %v821_v10 = vld [vmem:[#allocation8 + $0x300] sm:$0xff]  ;;  %v1040_v11 = vld [vmem:[#allocation10 + $0xf8] sm:$0xff]  ;;  %v559_v12 = vlaneseq }
 0x166   : > { %898 = vmatpush2.msra.mxu1 %v787_v13  ;;  %969 = vmatpush2.msra.mxu0 %v851_v14 }
 0x167   : > { %899 = vmatprep.subr.mxu1 %v786_v15  ;;  %970 = vmatprep.subr.mxu0 %v850_v16  ;;  %v1865_v13 = vshrl.u32 %v559_v12, 7  ;;  %v557_v16 = vld [vmem:[%s1935_s4] sm:$0xf] }
 0x168   : > { %900 = vmatpush2.msra.mxu1 %v785_v17  ;;  %971 = vmatpush2.msra.mxu0 %v849_v18 }
 0x169   : > { %901 = vmatprep.subr.mxu1 %v784_v19  ;;  %972 = vmatprep.subr.mxu0 %v848_v20  ;;  %v561_v14 = vsub.s32 0, %v1865_v13  ;;  %v569_v15 = vsub.s32 2, %v1865_v13  ;;  %v565_v17 = vsub.s32 1, %v1865_v13  ;;  %v573_v18 = vsub.s32 3, %v1865_v13  ;;  %v1260_v13 = vld [vmem:[%s1939_s8] ss:$0 sm:$0xff] }
 0x16a   : > { %902 = vmatpush2.msra.mxu1 %v783_v21  ;;  %973 = vmatpush2.msra.mxu0 %v847_v22 }
 0x16b   : > { %903 = vmatprep.subr.mxu1 %v782_v23  ;;  %974 = vmatprep.subr.mxu0 %v846_v24  ;;  %v562_v19 = vrot.slane %v557_v16, %v561_v14  ;;  %v570_v20 = vrot.slane %v557_v16, %v569_v15  ;;  %v566_v21 = vrot.slane %v557_v16, %v565_v17 }
 0x16c   : > { %904 = vmatpush2.msra.mxu1 %v781_v25  ;;  %975 = vmatpush2.msra.mxu0 %v845_v26  ;;  %v574_v22 = vrot.slane %v557_v16, %v573_v18 }
 0x16d   : > { %905 = vmatprep.subr.mxu1 %v780_v27  ;;  %976 = vmatprep.subr.mxu0 %v844_v28 }
 0x16e   : > { %906 = vmatpush2.msra.mxu1 %v779_v29  ;;  %977 = vmatpush2.msra.mxu0 %v843_v30 }
 0x16f   : > { %907 = vmatprep.subr.mxu1 %v778_v31  ;;  %978 = vmatprep.subr.mxu0 %v842_v32 }
 0x170   : > { %908 = vmatpush2.msra.mxu1 %v777_v33  ;;  %979 = vmatpush2.msra.mxu0 %v841_v34 }
 0x171   : > { %909 = vmatprep.subr.mxu1 %v776_v35  ;;  %980 = vmatprep.subr.mxu0 %v840_v36  ;;  %v1024_v35 = vld [vmem:[#allocation10 + $0x78] sm:$0xff]  ;;  %v1039_v36 = vld [vmem:[#allocation10 + $0xf0] sm:$0xff] }
 0x172   : > { %910 = vmatpush2.msra.mxu1 %v775_v37  ;;  %981 = vmatpush2.msra.mxu0 %v839_v38  ;;  %v1023_v37 = vld [vmem:[#allocation10 + $0x70] sm:$0xff]  ;;  %v1038_v38 = vld [vmem:[#allocation10 + $0xe8] sm:$0xff] }
 0x173   : > { %911 = vmatprep.subr.mxu1 %v774_v39  ;;  %982 = vmatprep.subr.mxu0 %v838_v40  ;;  %v1022_v39 = vld [vmem:[#allocation10 + $0x68] sm:$0xff]  ;;  %v1037_v40 = vld [vmem:[#allocation10 + $0xe0] sm:$0xff] }
 0x174   : > { %912 = vmatpush2.msra.mxu1 %v773_v41  ;;  %983 = vmatpush2.msra.mxu0 %v837_v42  ;;  %v1021_v41 = vld [vmem:[#allocation10 + $0x60] sm:$0xff]  ;;  %v1036_v42 = vld [vmem:[#allocation10 + $0xd8] sm:$0xff] }
 0x175   : > { %913 = vmatprep.subr.mxu1 %v772_v43  ;;  %984 = vmatprep.subr.mxu0 %v836_v44  ;;  %v1020_v43 = vld [vmem:[#allocation10 + $0x58] sm:$0xff]  ;;  %v1035_v44 = vld [vmem:[#allocation10 + $0xd0] sm:$0xff] }
 0x176   : > { %914 = vmatpush2.msra.mxu1 %v771_v45  ;;  %985 = vmatpush2.msra.mxu0 %v835_v46  ;;  %v1019_v45 = vld [vmem:[#allocation10 + $0x50] sm:$0xff]  ;;  %v1034_v46 = vld [vmem:[#allocation10 + $0xc8] sm:$0xff] }
 0x177   : > { %915 = vmatprep.subr.mxu1 %v770_v47  ;;  %986 = vmatprep.subr.mxu0 %v834_v48  ;;  %v1018_v47 = vld [vmem:[#allocation10 + $0x48] sm:$0xff]  ;;  %v1033_v48 = vld [vmem:[#allocation10 + $0xc0] sm:$0xff] }
 0x178   : > { %916 = vmatpush2.msra.mxu1 %v769_v49  ;;  %987 = vmatpush2.msra.mxu0 %v833_v50  ;;  %v1017_v49 = vld [vmem:[#allocation10 + $0x40] sm:$0xff]  ;;  %v1032_v50 = vld [vmem:[#allocation10 + $0xb8] sm:$0xff] }
 0x179   : > { %917 = vmatprep.subr.mxu1 %v768_v51  ;;  %988 = vmatprep.subr.mxu0 %v832_v52  ;;  %v1016_v51 = vld [vmem:[#allocation10 + $0x38] sm:$0xff]  ;;  %v1031_v52 = vld [vmem:[#allocation10 + $0xb0] sm:$0xff] }
 0x17a   : > { %918 = vmatpush2.msra.mxu1 %v767_v53  ;;  %989 = vmatpush2.msra.mxu0 %v831_v54  ;;  %v1015_v53 = vld [vmem:[#allocation10 + $0x30] sm:$0xff]  ;;  %v1030_v54 = vld [vmem:[#allocation10 + $0xa8] sm:$0xff] }
 0x17b   : > { %919 = vmatprep.subr.mxu1 %v766_v55  ;;  %990 = vmatprep.subr.mxu0 %v830_v56  ;;  %v1014_v55 = vld [vmem:[#allocation10 + $0x28] sm:$0xff]  ;;  %v1029_v56 = vld [vmem:[#allocation10 + $0xa0] sm:$0xff] }
 0x17c   : > { %920 = vmatpush2.msra.mxu1 %v765_v57  ;;  %991 = vmatpush2.msra.mxu0 %v829_v58  ;;  %v1013_v57 = vld [vmem:[#allocation10 + $0x20] sm:$0xff]  ;;  %v1028_v58 = vld [vmem:[#allocation10 + $0x98] sm:$0xff] }
 0x17d   : > { %921 = vmatprep.subr.mxu1 %v764_v59  ;;  %992 = vmatprep.subr.mxu0 %v828_v60  ;;  %v1012_v59 = vld [vmem:[#allocation10 + $0x18] sm:$0xff]  ;;  %v1027_v60 = vld [vmem:[#allocation10 + $0x90] sm:$0xff] }
 0x17e   : > { %922 = vmatpush2.msra.mxu1 %v763_v61  ;;  %993 = vmatpush2.msra.mxu0 %v827_v62  ;;  %v1011_v61 = vld [vmem:[#allocation10 + $0x10] sm:$0xff]  ;;  %v1026_v62 = vld [vmem:[#allocation10 + $0x88] sm:$0xff] }
 0x17f   : > { %923 = vmatprep.subr.mxu1 %v762_v63  ;;  %994 = vmatprep.subr.mxu0 %v826_v1  ;;  %v1010_v63 = vld [vmem:[#allocation10 + $0x8] sm:$0xff]  ;;  %v1025_v1 = vld [vmem:[#allocation10 + $0x80] sm:$0xff] }
 0x180   : > { %924 = vmatpush2.msra.mxu1 %v761_v2  ;;  %995 = vmatpush2.msra.mxu0 %v825_v3  ;;  %v1009_v2 = vld [vmem:[#allocation10] sm:$0xff]  ;;  %v853_v3 = vld [vmem:[%s1937_s6] sm:$0x3] }
 0x181   : > { %925 = vmatprep.subr.mxu1 %v760_v4  ;;  %996 = vmatprep.subr.mxu0 %v824_v0  ;;  %v858_v4 = vrot.slane %v853_v3, %v561_v14  ;;  %v862_v0 = vrot.slane %v853_v3, %v565_v17 }
 0x182   : > { %926 = vmatpush2.msra.mxu1 %v759_v5  ;;  %997 = vmatpush2.msra.mxu0 %v823_v6 }
 0x183   : > { %927 = vmatprep.subr.mxu1 %v758_v7  ;;  %998 = vmatprep.subr.mxu0 %v822_v8 }
 0x184   : > { %928 = vmatpush2.msra.mxu1 %v757_v9  ;;  %999 = vmatpush2.msra.mxu0 %v821_v10 }
 0x185   : > { %1270 = vmatprep.subr.mxu1 %v1040_v11 }
 0x205   : > { %v645_v23 = vpop.f32.mrf.mxu1  ;;  %v716_v24 = vpop.f32.mrf.mxu0 }
 0x206   : > { %v646_v25 = vadd.f32 %v645_v23, %v562_v19  ;;  %v717_v26 = vadd.f32 %v716_v24, %v570_v20 }
 0x207   : > { %v647_v27 = vpop.f32.mrf.mxu1  ;;  %v718_v28 = vpop.f32.mrf.mxu0 }
 0x208   : > { %v648_v29 = vadd.f32 %v647_v27, %v566_v21  ;;  %v719_v30 = vadd.f32 %v718_v28, %v574_v22  ;;  %v721_v33 = vmax.f32 %v646_v25, 0.0  ;;  %v723_v34 = vmax.f32 %v717_v26, 0.0 }
 0x20a   : > { %v722_v31 = vmax.f32 %v648_v29, 0.0  ;;  %v724_v32 = vmax.f32 %v719_v30, 0.0 }
 0x20c   : > { %929 = vmatprep.mubr.f32.mxu1 %v722_v31  ;;  %1000 = vmatprep.mubr.f32.mxu0 %v724_v32 }
 0x20d   : > { %930 = vmatmul.mubr.f32.vlgmr.msra.gmra.mxu1 %v721_v33  ;;  %1001 = vmatmul.mubr.f32.vlgmr.msra.gmra.mxu0 %v723_v34 }
 0x20e   : > { %1271 = vmatpush3.msra.mxu1 %v1024_v35 }
 0x20f   : > { %1272 = vmatprep.subr.mxu1 %v1039_v36 }
 0x210   : > { %1273 = vmatpush3.msra.mxu1 %v1023_v37 }
 0x211   : > { %1274 = vmatprep.subr.mxu1 %v1038_v38 }
 0x212   : > { %1275 = vmatpush3.msra.mxu1 %v1022_v39 }
 0x213   : > { %1276 = vmatprep.subr.mxu1 %v1037_v40 }
 0x214   : > { %1277 = vmatpush3.msra.mxu1 %v1021_v41 }
 0x215   : > { %1278 = vmatprep.subr.mxu1 %v1036_v42 }
 0x216   : > { %1279 = vmatpush3.msra.mxu1 %v1020_v43 }
 0x217   : > { %1280 = vmatprep.subr.mxu1 %v1035_v44 }
 0x218   : > { %1281 = vmatpush3.msra.mxu1 %v1019_v45 }
 0x219   : > { %1282 = vmatprep.subr.mxu1 %v1034_v46 }
 0x21a   : > { %1283 = vmatpush3.msra.mxu1 %v1018_v47 }
 0x21b   : > { %1284 = vmatprep.subr.mxu1 %v1033_v48 }
 0x21c   : > { %1285 = vmatpush3.msra.mxu1 %v1017_v49 }
 0x21d   : > { %1286 = vmatprep.subr.mxu1 %v1032_v50 }
 0x21e   : > { %1287 = vmatpush3.msra.mxu1 %v1016_v51 }
 0x21f   : > { %1288 = vmatprep.subr.mxu1 %v1031_v52 }
 0x220   : > { %1289 = vmatpush3.msra.mxu1 %v1015_v53 }
 0x221   : > { %1290 = vmatprep.subr.mxu1 %v1030_v54 }
 0x222   : > { %1291 = vmatpush3.msra.mxu1 %v1014_v55 }
 0x223   : > { %1292 = vmatprep.subr.mxu1 %v1029_v56 }
 0x224   : > { %1293 = vmatpush3.msra.mxu1 %v1013_v57 }
 0x225   : > { %1294 = vmatprep.subr.mxu1 %v1028_v58 }
 0x226   : > { %1295 = vmatpush3.msra.mxu1 %v1012_v59 }
 0x227   : > { %1296 = vmatprep.subr.mxu1 %v1027_v60 }
 0x228   : > { %1297 = vmatpush3.msra.mxu1 %v1011_v61 }
 0x229   : > { %1298 = vmatprep.subr.mxu1 %v1026_v62 }
 0x22a   : > { %1299 = vmatpush3.msra.mxu1 %v1010_v63 }
 0x22b   : > { %1300 = vmatprep.subr.mxu1 %v1025_v1 }
 0x22c   : > { %1301 = vmatpush3.msra.mxu1 %v1009_v2 }
 0x2cd   : > { %v931_v5 = vpop.f32.mrf.mxu1  ;;  %v1002_v6 = vpop.f32.mrf.mxu0 }
 0x2ce   : > { %v932_v7 = vadd.f32 %v931_v5, %v858_v4 }
 0x2cf   : > { %v933_v8 = vpop.f32.mrf.mxu1  ;;  %v1004_v11 = vpop.f32.mrf.mxu0 }
 0x2d0   : > { %v934_v9 = vadd.f32 %v933_v8, %v862_v0  ;;  %v1003_v10 = vadd.f32 %v1002_v6, %v932_v7 }
 0x2d2   : > { %v1005_v12 = vadd.f32 %v1004_v11, %v934_v9  ;;  %v1007_v16 = vmax.f32 %v1003_v10, 0.0 }
 0x2d4   : > { %v1008_v15 = vmax.f32 %v1005_v12, 0.0 }
 0x2d6   : > { %1112 = vmatprep.mubr.f32.mxu1 %v1008_v15 }
 0x2d7   : > { %1113 = vmatmul.mubr.f32.vlgmr.msra.gmra.mxu1 %v1007_v16 }
 0x397   : > { %v1302_v18 = vpop.f32.mrf.mxu1 }
 0x399   : > { %v1303_v14 = vpop.f32.mrf.mxu1 }
 0x39a   : > { %v1304_v17 = vadd.f32 %v1303_v14, %v1302_v18 }
 0x39c   : > { %v1115_v19 = vadd.f32 %v1304_v17, %v1260_v13 }
 0x39e   : > { %1411 = vtanh.f32 %v1115_v19 }
 0x3ab   : > { %v1412_v20 = vpop.eup %1411 }
 0x3ac   : > { %1119 = vst [vmem:[%s405_s19] sm:$0xff] %v1412_v20 }
 0x3ad   : > { %1558 = shalt.err (!%p1555_p11)
}
 0x3ae   : > { %s1559_s27 = scalar_lea.hbm %s1894_s7, 128  ;;  %s1563_s17 = scalar_lea.hbm %s1940_s9, 256 }
 0x3af   : > { %p1560_p13 = scmp.ne.s32.totalorder %s1894_s7, %s1559_s27  ;;  %p1564_p4 = scmp.lt.s32.totalorder %s1894_s7, %s1940_s9 }
 0x3b0   : > { %p1565_p6 = scmp.lt.s32.totalorder %s1563_s17, %s1559_s27 }
 0x3b1   : > { %p1561_p1 = pnand %p1560_p13, %p1966_p7 }
 0x3b2   : > { %p1566_p5 = por %p1565_p6, %p1564_p4 }
 0x3b3   : > { %p1562_p3 = pneg %p1561_p1 }
 0x3b5   : > { %p1567_p8 = pnand %p1566_p5, %p1562_p3 }
 0x3b7   : > { %1570 = shalt.err (!%p1567_p8)
}
 0x3b8   : > { %1334 = dma.vmem_to_hbm [thread:$0]  (%p1966_p7), %s1135_s22, 128, %s1894_s7, %s1121_s1  }
 0x3b9 PF: > { %s1146_s18 = sand.u32 1, %s1605_s30   ;;  %p1967_p10 = scmp.ne.s32.totalorder %s1958_s26, 0 }
 0x3ba   : > { %p1968_p0 = scmp.ge.s32.totalorder %s1617_s12, 2  ;;  %s1147_s19 = scalar_lea.sflag [#allocation4], %s1146_s18 }
 0x3bc   : > { %p1354_p12 = pnand %p1968_p0, %p1967_p10 }
 0x3be   : > { %p1355_p2 = pneg %p1354_p12 }
 0x3c0   : > { %1600 = dma.done.wait (%p1355_p2), %s1147_s19, 128  }
 0x3c1   : > { %1602 = vsyncadd (%p1355_p2), %s1147_s19, 4294967168  ;;  %p24_p9 = scmp.ge.s32.totalorder %s1774_s13, 4   ;;  %s1969_s30 = smov %s1609_s10 }
 0x3c2   : > { %s1970_s10 = smov %s1613_s11  ;;  %s1971_s11 = smov %s1785_s20 }
 0x3c3   : > { %s1972_s12 = smov %s1774_s13  ;;  %26 = sbr.rel (!%p24_p9) target bundleno = 12 (0xc), region = 117 }
 0x3c8   :  { %1152 = vsyncpa [#allocation3], 1 }
 0x3c9   :  { %1154 = vsyncpa [#allocation3 + $0x1], 1 }
 0x3ca   :  { %1155 = vsyncpa [#allocation6], 1 }
 0x3cb   :  { %1156 = vsyncpa [#allocation9], 1 }
 0x3cc   :  { %1157 = vsyncpa [#allocation4], 1 }
 0x3cd   :  { %1159 = vsyncpa [#allocation4 + $0x1], 1 }

</bundles_post_ra>
